<compile_context>
chip_gen: v5e
topology: v5e:2x2
jax: 0.10.0
libtpu: 0.0.40
codegen_flags: <defaults>
</compile_context>

<pallas_src>
import jax
import jax.numpy as jnp
from jax.experimental import pallas as pl
from jax.experimental.pallas import tpu as pltpu

EMBED = 100                     # embedding_dim
F1, F2 = 50, 60                 # num_filters for filter_sizes (1, 2)
FSUM = F1 + F2                  # 110
FEAT_PAD = 128                  # padded feature width (= one vreg lane span)
NUM_CLASSES = 100
CLS_PAD = 128                   # lane-padded class count
BN_EPS = 1e-5
MM_DTYPE = jnp.bfloat16         # MXU operand dtype (accumulation stays f32)


def discriminator_kernel(x_ref, wc_ref, bc_ref, wh_ref, bh_ref,
                         wfc_ref, bfc_ref, out_ref):
    # Fused conv (BN already folded into wc/bc): one (TB,2E)x(2E,256) MXU matmul.
    conv = jnp.dot(x_ref[...], wc_ref[...],
                   preferred_element_type=jnp.float32) + bc_ref[...]
    r = jnp.maximum(conv, 0.0)                  # ReLU
    # layout: [c0 | c2 | 0] in lanes [0,128), [c1 | 0] in lanes [128,256)
    feat = jnp.maximum(r[:, :FEAT_PAD], r[:, FEAT_PAD:])   # (TB,128)=[pool1|pool2|0]

    # Highway layer (single linear reused for gate and transform, as in reference).
    h = jnp.dot(feat.astype(MM_DTYPE), wh_ref[...],
                preferred_element_type=jnp.float32) + bh_ref[...]
    t = jax.nn.sigmoid(h)
    hw = feat + t * (jnp.maximum(h, 0.0) - feat)

    # Dropout -> identity.  Final linear; padded class lanes carry a -1e30 bias.
    logits = jnp.dot(hw.astype(MM_DTYPE), wfc_ref[...],
                     preferred_element_type=jnp.float32) + bfc_ref[...]

    # log_softmax over the padded 128 lanes (padding exp-underflows to 0).
    m = jnp.max(logits, axis=1, keepdims=True)
    z = logits - m
    lse = jnp.log(jnp.sum(jnp.exp(z), axis=1, keepdims=True))
    out_ref[...] = (z - lse).astype(out_ref.dtype)


def pack_params(p):
    """Fuse + lane-pad PyTorch-shaped (pre-transposed) params for the kernel.

    The fused-conv columns are arranged so the pooled feature slab comes out
    contiguous: [pool1 (50) | pool2 (60) | 0 (18)] in 128 lanes, matching the
    torch.cat(pools, 1) order, so highway/fc weights pad contiguously.
    """
    E = EMBED
    wc = jnp.zeros((2 * E, 2 * FEAT_PAD), jnp.float32)
    wc = wc.at[:E, 0:F1].set(p["w1"])                       # c0 = row0 @ w1
    wc = wc.at[:, F1:F1 + F2].set(p["w2"])                  # c2 = [row0,row1] @ w2
    wc = wc.at[E:2 * E, FEAT_PAD:FEAT_PAD + F1].set(p["w1"])  # c1 = row1 @ w1
    bc = jnp.zeros((1, 2 * FEAT_PAD), jnp.float32)
    bc = bc.at[0, 0:F1].set(p["b1"][0])
    bc = bc.at[0, F1:F1 + F2].set(p["b2"][0])
    bc = bc.at[0, FEAT_PAD:FEAT_PAD + F1].set(p["b1"][0])

    wh = jnp.zeros((FEAT_PAD, FEAT_PAD), jnp.float32).at[:FSUM, :FSUM].set(p["wh"])
    bh = jnp.zeros((1, FEAT_PAD), jnp.float32).at[0, :FSUM].set(p["bh"][0])

    wfc = jnp.zeros((FEAT_PAD, CLS_PAD), jnp.float32).at[:FSUM, :NUM_CLASSES].set(p["wfc"])
    bfc = jnp.full((1, CLS_PAD), -1e30, jnp.float32).at[0, :NUM_CLASSES].set(p["bfc"][0])

    # wc/bc kept in f32: the per-batch BatchNorm fold rescales them each call.
    return dict(wc=wc, bc=bc,
                wh=wh.astype(MM_DTYPE), bh=bh,
                wfc=wfc.astype(MM_DTYPE), bfc=bfc)


def _round_up(v, m):
    return ((v + m - 1) // m) * m


def discriminator_forward(x, packed, *, batch_tile=4096, slice_output=True,
                          out_dtype=jnp.float32):
    """x: (batch, seq_len) with batch*seq_len divisible by 2*EMBED (mirrors x.view).

    slice_output=True  -> (B, NUM_CLASSES), module-parity semantics.
    slice_output=False -> padded (Bp, 128) log-probs; consumer must only read
                          rows < B and lanes < NUM_CLASSES (saves an extra
                          output-sized HBM copy).
    """
    B = (x.shape[0] * x.shape[1]) // (2 * EMBED)
    x_f32 = x.reshape(B, 2 * EMBED).astype(jnp.float32)

    # Single-pass BatchNorm2d(1) training-mode batch statistics (biased var),
    # f32 accumulation; fused by XLA with the bf16 cast below when jitted.
    n = x_f32.size
    s1 = jnp.sum(x_f32)
    s2 = jnp.sum(x_f32 * x_f32)
    mean = s1 / n
    var = jnp.maximum(s2 / n - mean * mean, 0.0)
    rstd = jax.lax.rsqrt(var + BN_EPS)

    # Fold BN into the conv weights/bias (tiny 200x256 XLA ops per batch) so the
    # kernel reads bf16 x directly.
    wc_scaled = (packed["wc"] * rstd).astype(MM_DTYPE)
    bc_adj = packed["bc"] - (mean * rstd) * jnp.sum(packed["wc"], axis=0, keepdims=True)
    x_bf = x_f32.astype(MM_DTYPE)

    # Batch tile: multiple of 16 (bf16 sublane packing); cap so the grid has at
    # least two tiles when the batch allows (both v7x TensorCores get work).
    ALIGN = 16
    half = _round_up(max(pl.cdiv(B, 2), 1), ALIGN)
    TB = max(ALIGN, min(_round_up(batch_tile, ALIGN), half))
    n_tiles = pl.cdiv(B, TB)
    Bp = n_tiles * TB
    if Bp != B:
        x_bf = jnp.pad(x_bf, ((0, Bp - B), (0, 0)))

    pinned = lambda arr: pl.BlockSpec(arr.shape, lambda i: (0, 0))
    in_specs = [
        pl.BlockSpec((TB, 2 * EMBED), lambda i: (i, 0)),
        pinned(wc_scaled), pinned(bc_adj),
        pinned(packed["wh"]), pinned(packed["bh"]),
        pinned(packed["wfc"]), pinned(packed["bfc"]),
    ]
    out_spec = pl.BlockSpec((TB, CLS_PAD), lambda i: (i, 0))

    # VMEM budget: pinned weights (x2 buffers), double-buffered x/out tiles, and
    # f32 intermediates (conv: 256 lanes, feat/h/hw/logits: 128 lanes each).
    weights = (wc_scaled, bc_adj, packed["wh"], packed["bh"],
               packed["wfc"], packed["bfc"])
    weight_bytes = sum(int(w.size) * w.dtype.itemsize for w in weights)
    out_itemsize = jnp.dtype(out_dtype).itemsize
    row_bytes = (2 * (2 * EMBED) * 2              # x tile (bf16), double-buffered
                 + 2 * CLS_PAD * out_itemsize     # out tile, double-buffered
                 + (2 * FEAT_PAD + 4 * FEAT_PAD) * 4)  # f32 intermediates
    vmem_bytes = min(2 * weight_bytes + TB * row_bytes + (8 << 20), 48 << 20)

    out_padded = pl.pallas_call(
        discriminator_kernel,
        out_shape=jax.ShapeDtypeStruct((Bp, CLS_PAD), out_dtype),
        grid=(n_tiles,),
        in_specs=in_specs,
        out_specs=out_spec,
        compiler_params=pltpu.CompilerParams(
            dimension_semantics=("parallel",),
            vmem_limit_bytes=int(vmem_bytes)),
    )(x_bf, wc_scaled, bc_adj, packed["wh"], packed["bh"],
      packed["wfc"], packed["bfc"])

    if slice_output:
        return out_padded[:B, :NUM_CLASSES]
    return out_padded


def init_params(key):
    """Deterministic PyTorch-like uniform(-1/sqrt(fan_in), 1/sqrt(fan_in)) init,
    weights pre-transposed to (in, out)."""
    ks = jax.random.split(key, 8)

    def uni(k, shape, fan_in):
        bound = 1.0 / (fan_in ** 0.5)
        return jax.random.uniform(k, shape, jnp.float32, -bound, bound)

    return dict(
        w1=uni(ks[0], (EMBED, F1), EMBED),            # Conv2d(1,50,(1,E))
        b1=uni(ks[1], (1, F1), EMBED),
        w2=uni(ks[2], (2 * EMBED, F2), 2 * EMBED),    # Conv2d(1,60,(2,E))
        b2=uni(ks[3], (1, F2), 2 * EMBED),
        wh=uni(ks[4], (FSUM, FSUM), FSUM),            # highway Linear(110,110)
        bh=uni(ks[5], (1, FSUM), FSUM),
        wfc=uni(ks[6], (FSUM, NUM_CLASSES), FSUM),    # fc Linear(110,100)
        bfc=uni(ks[7], (1, NUM_CLASSES), FSUM),
    )


def reference_forward(x, p):
    """Pure-JAX f32 reference mirroring the PyTorch forward (eval-mode dropout)."""
    B = (x.shape[0] * x.shape[1]) // (2 * EMBED)
    xr = x.reshape(B, 2, EMBED).astype(jnp.float32)
    mean = jnp.mean(xr)
    var = jnp.mean(jnp.square(xr - mean))
    xn = (xr - mean) * jax.lax.rsqrt(var + BN_EPS)
    c0 = xn[:, 0, :] @ p["w1"] + p["b1"]
    c1 = xn[:, 1, :] @ p["w1"] + p["b1"]
    c2 = xn.reshape(B, 2 * EMBED) @ p["w2"] + p["b2"]
    pool1 = jnp.maximum(jax.nn.relu(c0), jax.nn.relu(c1))   # max_pool1d over 2 pos
    pool2 = jax.nn.relu(c2)                                  # single position
    feat = jnp.concatenate([pool1, pool2], axis=1)
    h = feat @ p["wh"] + p["bh"]
    t = jax.nn.sigmoid(h)
    hw = t * jax.nn.relu(h) + (1.0 - t) * feat
    logits = hw @ p["wfc"] + p["bfc"]
    return jax.nn.log_softmax(logits, axis=1)


if __name__ == "__main__":
    key = jax.random.PRNGKey(0)
    pkey, xkey = jax.random.split(key)
    params = init_params(pkey)
    packed = pack_params(params)

    # x: (batch_size, seq_len) with seq_len = 2 * embedding_dim so the internal
    # view keeps the same batch size.
    B, SEQ = 4, 2 * EMBED
    x = jax.random.normal(xkey, (B, SEQ), dtype=jnp.float32)

    # jit the wrapper so the single-pass BN stats, bf16 cast and BN->weight fold
    # fuse into a single pre-kernel pass over x.
    fwd = jax.jit(lambda xx, pp: discriminator_forward(xx, pp, slice_output=False))
    out_padded = jax.block_until_ready(fwd(x, packed))

    # Lazy consumer-side view: rows >= B and lanes >= NUM_CLASSES are padding.
    out = out_padded[:B, :NUM_CLASSES]

    assert out.shape == (B, NUM_CLASSES)
    assert bool(jnp.all(jnp.isfinite(out)))
    # rows of log_softmax must exponentiate-sum to 1
    assert bool(jnp.allclose(jnp.sum(jnp.exp(out), axis=1), 1.0, atol=1e-3))
    # numerical check against pure-JAX f32 reference (bf16 matmul tolerance)
    ref = reference_forward(x, params)
    assert float(jnp.max(jnp.abs(out - ref))) < 0.1
    print("KERNEL_OK")
</pallas_src>

<mosaic_0001>
module attributes {stable_mosaic.version = 11 : i64} {
  func.func @discriminator_kernel(%arg0: i32, %arg1: memref<16x200xbf16, #tpu.memory_space<vmem>>, %arg2: memref<200x256xbf16, #tpu.memory_space<vmem>>, %arg3: memref<1x256xf32, #tpu.memory_space<vmem>>, %arg4: memref<128x128xbf16, #tpu.memory_space<vmem>>, %arg5: memref<1x128xf32, #tpu.memory_space<vmem>>, %arg6: memref<128x128xbf16, #tpu.memory_space<vmem>>, %arg7: memref<1x128xf32, #tpu.memory_space<vmem>>, %arg8: memref<16x128xf32, #tpu.memory_space<vmem>>) attributes {dimension_semantics = [#tpu.dimension_semantics<parallel>], iteration_bounds = array<i64: 1>, scalar_prefetch = 0 : i64, scratch_operands = 0 : i64, tpu.core_type = #tpu.core_type<tc>, window_params = [{transform_indices = @transform_0, window_bounds = array<i64: 16, 200>}, {pipeline_mode = #tpu.pipeline_mode<synchronous>, transform_indices = @transform_1, window_bounds = array<i64: 200, 256>}, {pipeline_mode = #tpu.pipeline_mode<synchronous>, transform_indices = @transform_2, window_bounds = array<i64: 1, 256>}, {pipeline_mode = #tpu.pipeline_mode<synchronous>, transform_indices = @transform_3, window_bounds = array<i64: 128, 128>}, {pipeline_mode = #tpu.pipeline_mode<synchronous>, transform_indices = @transform_4, window_bounds = array<i64: 1, 128>}, {pipeline_mode = #tpu.pipeline_mode<synchronous>, transform_indices = @transform_5, window_bounds = array<i64: 128, 128>}, {pipeline_mode = #tpu.pipeline_mode<synchronous>, transform_indices = @transform_6, window_bounds = array<i64: 1, 128>}, {transform_indices = @transform_7, window_bounds = array<i64: 16, 128>}]} {
    %c0 = arith.constant 0 : index
    %c0_0 = arith.constant 0 : index
    %0 = vector.load %arg1[%c0, %c0_0] : memref<16x200xbf16, #tpu.memory_space<vmem>>, vector<16x200xbf16>
    %c0_1 = arith.constant 0 : index
    %c0_2 = arith.constant 0 : index
    %1 = vector.load %arg2[%c0_1, %c0_2] : memref<200x256xbf16, #tpu.memory_space<vmem>>, vector<200x256xbf16>
    %cst = arith.constant dense<0.000000e+00> : vector<16x256xf32>
    %2 = tpu.matmul %0, %1, %cst {dimension_numbers = #tpu.dot_dimension_numbers<[1], [0], [0], [1], [0, 0, 1, 1], [], []>} : vector<16x200xbf16>, vector<200x256xbf16>, vector<16x256xf32> -> vector<16x256xf32>
    %c0_3 = arith.constant 0 : index
    %c0_4 = arith.constant 0 : index
    %3 = vector.load %arg3[%c0_3, %c0_4] : memref<1x256xf32, #tpu.memory_space<vmem>>, vector<1x256xf32>
    %4 = vector.broadcast %3 : vector<1x256xf32> to vector<16x256xf32>
    %5 = arith.addf %2, %4 : vector<16x256xf32>
    %cst_5 = arith.constant 0.000000e+00 : f32
    %6 = vector.broadcast %cst_5 : f32 to vector<16x256xf32>
    %7 = arith.maximumf %5, %6 : vector<16x256xf32>
    %8 = vector.extract_strided_slice %7 {offsets = [0, 0], sizes = [16, 128], strides = [1, 1]} : vector<16x256xf32> to vector<16x128xf32>
    %9 = vector.extract_strided_slice %7 {offsets = [0, 128], sizes = [16, 128], strides = [1, 1]} : vector<16x256xf32> to vector<16x128xf32>
    %10 = arith.maximumf %8, %9 : vector<16x128xf32>
    %11 = arith.truncf %10 : vector<16x128xf32> to vector<16x128xbf16>
    %c0_6 = arith.constant 0 : index
    %c0_7 = arith.constant 0 : index
    %12 = vector.load %arg4[%c0_6, %c0_7] : memref<128x128xbf16, #tpu.memory_space<vmem>>, vector<128x128xbf16>
    %cst_8 = arith.constant dense<0.000000e+00> : vector<16x128xf32>
    %13 = tpu.matmul %11, %12, %cst_8 {dimension_numbers = #tpu.dot_dimension_numbers<[1], [0], [0], [1], [0, 0, 1, 1], [], []>} : vector<16x128xbf16>, vector<128x128xbf16>, vector<16x128xf32> -> vector<16x128xf32>
    %c0_9 = arith.constant 0 : index
    %c0_10 = arith.constant 0 : index
    %14 = vector.load %arg5[%c0_9, %c0_10] : memref<1x128xf32, #tpu.memory_space<vmem>>, vector<1x128xf32>
    %15 = vector.broadcast %14 : vector<1x128xf32> to vector<16x128xf32>
    %16 = arith.addf %13, %15 : vector<16x128xf32>
    %17 = arith.negf %16 : vector<16x128xf32>
    %18 = math.exp %17 : vector<16x128xf32>
    %cst_11 = arith.constant 1.000000e+00 : f32
    %19 = vector.broadcast %cst_11 : f32 to vector<16x128xf32>
    %20 = arith.addf %19, %18 : vector<16x128xf32>
    %21 = arith.divf %19, %20 : vector<16x128xf32>
    %cst_12 = arith.constant 0.000000e+00 : f32
    %22 = vector.broadcast %cst_12 : f32 to vector<16x128xf32>
    %23 = arith.maximumf %16, %22 : vector<16x128xf32>
    %24 = arith.subf %23, %10 : vector<16x128xf32>
    %25 = arith.mulf %21, %24 : vector<16x128xf32>
    %26 = arith.addf %10, %25 : vector<16x128xf32>
    %27 = arith.truncf %26 : vector<16x128xf32> to vector<16x128xbf16>
    %c0_13 = arith.constant 0 : index
    %c0_14 = arith.constant 0 : index
    %28 = vector.load %arg6[%c0_13, %c0_14] : memref<128x128xbf16, #tpu.memory_space<vmem>>, vector<128x128xbf16>
    %cst_15 = arith.constant dense<0.000000e+00> : vector<16x128xf32>
    %29 = tpu.matmul %27, %28, %cst_15 {dimension_numbers = #tpu.dot_dimension_numbers<[1], [0], [0], [1], [0, 0, 1, 1], [], []>} : vector<16x128xbf16>, vector<128x128xbf16>, vector<16x128xf32> -> vector<16x128xf32>
    %c0_16 = arith.constant 0 : index
    %c0_17 = arith.constant 0 : index
    %30 = vector.load %arg7[%c0_16, %c0_17] : memref<1x128xf32, #tpu.memory_space<vmem>>, vector<1x128xf32>
    %31 = vector.broadcast %30 : vector<1x128xf32> to vector<16x128xf32>
    %32 = arith.addf %29, %31 : vector<16x128xf32>
    %cst_18 = arith.constant dense<0xFF800000> : vector<16xf32>
    %33 = vector.multi_reduction <maximumf>, %32, %cst_18 [1] : vector<16x128xf32> to vector<16xf32>
    %34 = vector.shape_cast %33 : vector<16xf32> to vector<16x1xf32>
    %35 = vector.broadcast %34 : vector<16x1xf32> to vector<16x128xf32>
    %36 = arith.subf %32, %35 : vector<16x128xf32>
    %37 = math.exp %36 : vector<16x128xf32>
    %cst_19 = arith.constant dense<0.000000e+00> : vector<16xf32>
    %38 = vector.multi_reduction <add>, %37, %cst_19 [1] : vector<16x128xf32> to vector<16xf32>
    %39 = vector.shape_cast %38 : vector<16xf32> to vector<16x1xf32>
    %40 = math.log %39 : vector<16x1xf32>
    %41 = vector.broadcast %40 : vector<16x1xf32> to vector<16x128xf32>
    %42 = arith.subf %36, %41 : vector<16x128xf32>
    %c0_20 = arith.constant 0 : index
    %c0_21 = arith.constant 0 : index
    %43 = vector.load %arg8[%c0_20, %c0_21] : memref<16x128xf32, #tpu.memory_space<vmem>>, vector<16x128xf32>
    tpu.vector_store %arg8[%c0_20, %c0_21], %42 {strides = array<i32>} : memref<16x128xf32, #tpu.memory_space<vmem>>, vector<16x128xf32>,
    return
  }
  func.func @transform_0(%arg0: i32) -> (i32, i32) {
    %c0_i32 = arith.constant 0 : i32
    %c0_i32_0 = arith.constant 0 : i32
    return %arg0, %c0_i32 : i32, i32
  }
  func.func @transform_1(%arg0: i32) -> (i32, i32) {
    %c0_i32 = arith.constant 0 : i32
    %c0_i32_0 = arith.constant 0 : i32
    %c0_i32_1 = arith.constant 0 : i32
    return %c0_i32, %c0_i32_0 : i32, i32
  }
  func.func @transform_2(%arg0: i32) -> (i32, i32) {
    %c0_i32 = arith.constant 0 : i32
    %c0_i32_0 = arith.constant 0 : i32
    %c0_i32_1 = arith.constant 0 : i32
    return %c0_i32, %c0_i32_0 : i32, i32
  }
  func.func @transform_3(%arg0: i32) -> (i32, i32) {
    %c0_i32 = arith.constant 0 : i32
    %c0_i32_0 = arith.constant 0 : i32
    %c0_i32_1 = arith.constant 0 : i32
    return %c0_i32, %c0_i32_0 : i32, i32
  }
  func.func @transform_4(%arg0: i32) -> (i32, i32) {
    %c0_i32 = arith.constant 0 : i32
    %c0_i32_0 = arith.constant 0 : i32
    %c0_i32_1 = arith.constant 0 : i32
    return %c0_i32, %c0_i32_0 : i32, i32
  }
  func.func @transform_5(%arg0: i32) -> (i32, i32) {
    %c0_i32 = arith.constant 0 : i32
    %c0_i32_0 = arith.constant 0 : i32
    %c0_i32_1 = arith.constant 0 : i32
    return %c0_i32, %c0_i32_0 : i32, i32
  }
  func.func @transform_6(%arg0: i32) -> (i32, i32) {
    %c0_i32 = arith.constant 0 : i32
    %c0_i32_0 = arith.constant 0 : i32
    %c0_i32_1 = arith.constant 0 : i32
    return %c0_i32, %c0_i32_0 : i32, i32
  }
  func.func @transform_7(%arg0: i32) -> (i32, i32) {
    %c0_i32 = arith.constant 0 : i32
    %c0_i32_0 = arith.constant 0 : i32
    return %arg0, %c0_i32 : i32, i32
  }
}

</mosaic_0001>

<bundles_post_ra>
// kernel: sub.3
= control target key start
LH: loop header
LB: loop body
LE: loop exit
PB: predicated region body
PF: predicated region fallthrough
CT: control target
= control target key end

     0   :  { %s56_s0 = inlined_call_operand.vmem [shape: f32[1,256], index: 0, kind: input, shape index: {}]   ;;  %s57_s1 = inlined_call_operand.vmem [shape: f32[1,256], index: 1, kind: input, shape index: {}]   ;;  %s58_s2 = inlined_call_operand.vmem [shape: f32[1,256], index: 2, kind: output, shape index: {}]  }
   0x1   :  { %v3_v0 = vld [vmem:[%s56_s0] sm:$0x1]  ;;  %v20_v2 = vld [vmem:[%s56_s0 + $0x1] sm:$0x1] }
   0x2   :  { %v4_v1 = vld [vmem:[%s57_s1] sm:$0x1]  ;;  %v21_v4 = vld [vmem:[%s57_s1 + $0x1] sm:$0x1] }
   0x3   :  { %v7_v3 = vsub.f32 %v3_v0, %v4_v1  ;;  %v16_v5 = vsub.f32 %v20_v2, %v21_v4 }
   0x5   :  { %9 = vst [vmem:[%s58_s2] sm:$0x1] %v7_v3 }
   0x6   :  { %22 = vst [vmem:[%s58_s2 + $0x1] sm:$0x1] %v16_v5 }

// kernel: _lambda_.1
= control target key start
LH: loop header
LB: loop body
LE: loop exit
PB: predicated region body
PF: predicated region fallthrough
CT: control target
= control target key end

     0   :  { %vm199_vm0 = vcmask 1043456   ;;  %s1055_s0 = inlined_call_operand.vmem [shape: bf16[16,200], index: 0, kind: input, shape index: {}]   ;;  %s1056_s1 = inlined_call_operand.vmem [shape: bf16[200,256], index: 1, kind: input, shape index: {}]   ;;  %s1057_s2 = inlined_call_operand.vmem [shape: f32[1,256], index: 2, kind: input, shape index: {}]   ;;  %s1058_s3 = inlined_call_operand.vmem [shape: bf16[128,128], index: 3, kind: input, shape index: {}]   ;;  %s1059_s4 = inlined_call_operand.vmem [shape: f32[1,128], index: 4, kind: input, shape index: {}]   ;;  %s1060_s5 = inlined_call_operand.vmem [shape: bf16[128,128], index: 5, kind: input, shape index: {}]   ;;  %s1061_s6 = inlined_call_operand.vmem [shape: f32[1,128], index: 6, kind: input, shape index: {}]   ;;  %s1062_s7 = inlined_call_operand.hbm [shape: f32[16,128], index: 7, kind: output, shape index: {}]  }
   0x1   :  { %v586_v0 = vld [vmem:[%s1056_s1 + $0x70] sm:$0xf]  ;;  %v709_v1 = vld [vmem:[%s1056_s1 + $0x74] sm:$0xf0]  ;;  %v708_v2 = vld [vmem:[%s1056_s1 + $0x74] sm:$0xf] }
   0x2   :  { %v587_v3 = vor.u32 %v709_v1, %v586_v0  ;;  %v588_v4 = vld [vmem:[%s1056_s1 + $0x78] sm:$0xf0]  ;;  %v578_v5 = vld [vmem:[%s1056_s1 + $0x60] sm:$0xf]  ;;  %v707_v6 = vld [vmem:[%s1056_s1 + $0x64] sm:$0xf0] }
   0x3   :  { %v591_v7 = vor.u32 %v708_v2, %v588_v4  ;;  %v706_v8 = vld [vmem:[%s1056_s1 + $0x64] sm:$0xf]  ;;  %v580_v9 = vld [vmem:[%s1056_s1 + $0x68] sm:$0xf0]  ;;  %v579_v11 = vor.u32 %v707_v6, %v578_v5  ;;  %v570_v15 = vld [vmem:[%s1056_s1 + $0x50] sm:$0xf] }
   0x4   :  { %v54_v10 = vld [vmem:[%s1056_s1 + $0xc0] sm:$0xff]  ;;  %206 = vmatpush.bf16.msra.mxu0 %v587_v3  ;;  %v583_v14 = vor.u32 %v706_v8, %v580_v9  ;;  %v705_v16 = vld [vmem:[%s1056_s1 + $0x54] sm:$0xf0]  ;;  %v704_v17 = vld [vmem:[%s1056_s1 + $0x54] sm:$0xf] }
   0x5   :  { %v144_v12 = vunpack.c.h.b16 %v54_v10  ;;  %v143_v13 = vunpack.c.l.b16 %v54_v10  ;;  %234 = vmatpush.bf16.msra.mxu2 %v591_v7  ;;  %v572_v19 = vld [vmem:[%s1056_s1 + $0x58] sm:$0xf0]  ;;  %v716_v20 = vld [vmem:[%s1056_s1 + $0xb4] sm:$0xf]  ;;  %v571_v24 = vor.u32 %v705_v16, %v570_v15  ;;  %v562_v25 = vld [vmem:[%s1056_s1 + $0x40] sm:$0xf] }
   0x6   :  { %v620_v21 = vld [vmem:[%s1056_s1 + $0xb8] sm:$0xf0]  ;;  %v703_v26 = vld [vmem:[%s1056_s1 + $0x44] sm:$0xf0]  ;;  %v575_v28 = vor.u32 %v704_v17, %v572_v19  ;;  %v702_v30 = vld [vmem:[%s1056_s1 + $0x44] sm:$0xf] }
   0x7   :  { %v170_v18 = vpack.c.b16 %v144_v12, %v144_v12  ;;  %v169_v22 = vpack.c.b16 %v143_v13, %v143_v13  ;;  %v623_v29 = vor.u32 %v716_v20, %v620_v21  ;;  %v618_v31 = vld [vmem:[%s1056_s1 + $0xb0] sm:$0xf]  ;;  %v717_v32 = vld [vmem:[%s1056_s1 + $0xb4] sm:$0xf0]  ;;  %v564_v33 = vld [vmem:[%s1056_s1 + $0x48] sm:$0xf0]  ;;  %v563_v38 = vor.u32 %v703_v26, %v562_v25 }
   0x8   :  { %207 = vmatpush.bf16.msra.mxu0 %v579_v11  ;;  %v714_v34 = vld [vmem:[%s1056_s1 + $0xa4] sm:$0xf]  ;;  %v612_v35 = vld [vmem:[%s1056_s1 + $0xa8] sm:$0xf0]  ;;  %v619_v36 = vor.u32 %v717_v32, %v618_v31  ;;  %v610_v37 = vld [vmem:[%s1056_s1 + $0xa0] sm:$0xf]  ;;  %v567_v40 = vor.u32 %v702_v30, %v564_v33 }
   0x9   :  { %v204_v23 = vsel %vm199_vm0, %v170_v18, 0  ;;  %v201_v27 = vsel %vm199_vm0, %v169_v22, 0  ;;  %235 = vmatpush.bf16.msra.mxu2 %v583_v14  ;;  %v715_v39 = vld [vmem:[%s1056_s1 + $0xa4] sm:$0xf0]  ;;  %v615_v41 = vor.u32 %v714_v34, %v612_v35  ;;  %v554_v42 = vld [vmem:[%s1056_s1 + $0x30] sm:$0xf] }
   0xa   :  { %251 = vmatpush.bf16.msra.mxu3 %v204_v23  ;;  %223 = vmatpush.bf16.msra.mxu1 %v201_v27  ;;  %v701_v43 = vld [vmem:[%s1056_s1 + $0x34] sm:$0xf0]  ;;  %v700_v44 = vld [vmem:[%s1056_s1 + $0x34] sm:$0xf]  ;;  %v556_v45 = vld [vmem:[%s1056_s1 + $0x38] sm:$0xf0]  ;;  %v611_v48 = vor.u32 %v715_v39, %v610_v37 }
   0xb   :  { %v712_v46 = vld [vmem:[%s1056_s1 + $0x94] sm:$0xf]  ;;  %v604_v47 = vld [vmem:[%s1056_s1 + $0x98] sm:$0xf0]  ;;  %v602_v49 = vld [vmem:[%s1056_s1 + $0x90] sm:$0xf]  ;;  %v555_v51 = vor.u32 %v701_v43, %v554_v42  ;;  %v559_v52 = vor.u32 %v700_v44, %v556_v45 }
   0xc   :  { %208 = vmatpush.bf16.msra.mxu0 %v571_v24  ;;  %v713_v50 = vld [vmem:[%s1056_s1 + $0x94] sm:$0xf0]  ;;  %v607_v53 = vor.u32 %v712_v46, %v604_v47  ;;  %v546_v54 = vld [vmem:[%s1056_s1 + $0x20] sm:$0xf]  ;;  %v699_v55 = vld [vmem:[%s1056_s1 + $0x24] sm:$0xf0] }
   0xd   :  { %236 = vmatpush.bf16.msra.mxu2 %v575_v28  ;;  %v698_v56 = vld [vmem:[%s1056_s1 + $0x24] sm:$0xf]  ;;  %v548_v57 = vld [vmem:[%s1056_s1 + $0x28] sm:$0xf0]  ;;  %v603_v60 = vor.u32 %v713_v50, %v602_v49  ;;  %v538_v61 = vld [vmem:[%s1056_s1 + $0x10] sm:$0xf]  ;;  %v547_v0 = vor.u32 %v699_v55, %v546_v54 }
   0xe   :  { %252 = vmatpush.bf16.msra.mxu3 %v623_v29  ;;  %224 = vmatpush.bf16.msra.mxu1 %v619_v36  ;;  %v710_v58 = vld [vmem:[%s1056_s1 + $0x84] sm:$0xf]  ;;  %v596_v59 = vld [vmem:[%s1056_s1 + $0x88] sm:$0xf0]  ;;  %v594_v62 = vld [vmem:[%s1056_s1 + $0x80] sm:$0xf]  ;;  %v551_v2 = vor.u32 %v698_v56, %v548_v57 }
   0xf   :  { %v711_v63 = vld [vmem:[%s1056_s1 + $0x84] sm:$0xf0]  ;;  %v697_v1 = vld [vmem:[%s1056_s1 + $0x14] sm:$0xf0]  ;;  %v599_v3 = vor.u32 %v710_v58, %v596_v59  ;;  %v692_v4 = vld [vmem:[%s1055_s0 + $0x4] sm:$0xf] }
  0x10   :  { %209 = vmatpush.bf16.msra.mxu0 %v563_v38  ;;  %v524_v5 = vld [vmem:[%s1055_s0 + $0x8] sm:$0xf0] }
  0x11   :  { %237 = vmatpush.bf16.msra.mxu2 %v567_v40 }
  0x12   :  { %253 = vmatpush.bf16.msra.mxu3 %v615_v41  ;;  %225 = vmatpush.bf16.msra.mxu1 %v611_v48 }
  0x14   :  { %210 = vmatpush.bf16.msra.mxu0 %v555_v51 }
  0x15   :  { %238 = vmatpush.bf16.msra.mxu2 %v559_v52 }
  0x16   :  { %254 = vmatpush.bf16.msra.mxu3 %v607_v53 }
  0x17   :  { %12 = vsyncpa [#allocation3], 0  ;;  %226 = vmatpush.bf16.msra.mxu1 %v603_v60  ;;  %v696_v6 = vld [vmem:[%s1056_s1 + $0x14] sm:$0xf]  ;;  %v540_v7 = vld [vmem:[%s1056_s1 + $0x18] sm:$0xf0]  ;;  %v595_v8 = vor.u32 %v711_v63, %v594_v62  ;;  %v539_v10 = vor.u32 %v697_v1, %v538_v61  ;;  %v527_v11 = vor.u32 %v692_v4, %v524_v5 }
  0x18   :  { %v725_v9 = vld [vmem:[%s1058_s3 + $0x38] sm:$0xff]  ;;  %211 = vmatpush.bf16.msra.mxu0 %v547_v0  ;;  %v543_v12 = vor.u32 %v696_v6, %v540_v7  ;;  %vm195_vm1 = vcmask 588800   ;;  %v530_v13 = vld [vmem:[%s1056_s1] sm:$0xf]  ;;  %v695_v14 = vld [vmem:[%s1056_s1 + $0x4] sm:$0xf0] }
  0x19   :  { %239 = vmatpush.bf16.msra.mxu2 %v551_v2  ;;  %v694_v15 = vld [vmem:[%s1056_s1 + $0x4] sm:$0xf]  ;;  %v532_v16 = vld [vmem:[%s1056_s1 + $0x8] sm:$0xf0]  ;;  %v724_v17 = vld [vmem:[%s1058_s3 + $0x30] sm:$0xff]  ;;  %v531_v18 = vor.u32 %v695_v14, %v530_v13  ;;  %s508_s25 = sshll.u32 %s1062_s7, 4  ;;  %s509_s25 = int_to_ptr.hbm [resolvable:$true] %s508_s25 }
  0x1a   :  { %255 = vmatpush.bf16.msra.mxu3 %v599_v3  ;;  %v522_v19 = vld [vmem:[%s1055_s0] sm:$0xf]  ;;  %v693_v20 = vld [vmem:[%s1055_s0 + $0x4] sm:$0xf0]  ;;  %v535_v21 = vor.u32 %v694_v15, %v532_v16  ;;  %v721_v25 = vld [vmem:[%s1058_s3 + $0x18] sm:$0xff]  ;;  %s782_s26 = smov 128  }
  0x1b   :  { %227 = vmatpush.bf16.msra.mxu1 %v595_v8  ;;  %v523_v22 = vor.u32 %v693_v20, %v522_v19  ;;  %v723_v23 = vld [vmem:[%s1058_s3 + $0x28] sm:$0xff]  ;;  %v722_v24 = vld [vmem:[%s1058_s3 + $0x20] sm:$0xff]  ;;  %v720_v26 = vld [vmem:[%s1058_s3 + $0x10] sm:$0xff]  ;;  %s783_s27 = smov 8  }
  0x1c   :  { %212 = vmatpush.bf16.msra.mxu0 %v539_v10  ;;  %v719_v27 = vld [vmem:[%s1058_s3 + $0x8] sm:$0xff]  ;;  %v718_v28 = vld [vmem:[%s1058_s3] sm:$0xff]  ;;  %v733_v55 = vld [vmem:[%s1060_s5 + $0x38] sm:$0xff] }
  0x1d   :  { %625 = vmatmul.msk.bf16.vlgmr.msra.gmra.mxu3 %vm195_vm1, %v527_v11  ;;  %240 = vmatpush.bf16.msra.mxu2 %v543_v12  ;;  %v55_v30 = vld [vmem:[%s1057_s2] sm:$0x3]  ;;  %v732_v56 = vld [vmem:[%s1060_s5 + $0x30] sm:$0xff]  ;;  %v731_v57 = vld [vmem:[%s1060_s5 + $0x28] sm:$0xff] }
  0x1e   :  { %624 = vmatmul.msk.bf16.vlgmr.msra.gmra.mxu1 %vm195_vm1, %v527_v11  ;;  %v57_v32 = vperm.slane %v55_v30, 0  ;;  %v58_v33 = vperm.slane %v55_v30, 1  ;;  %466 = vmatpush.bf16.msrb.mxu3 %v733_v55  ;;  %v730_v58 = vld [vmem:[%s1060_s5 + $0x20] sm:$0xff]  ;;  %v729_v59 = vld [vmem:[%s1060_s5 + $0x18] sm:$0xff]  ;;  %v728_v62 = vld [vmem:[%s1060_s5 + $0x10] sm:$0xff] }
  0x1f   :  { %337 = vmatpush.bf16.msrb.mxu1 %v725_v9  ;;  %v737_v60 = vld [vmem:[%s1059_s4] ss:$0 sm:$0xff]  ;;  %v727_v1 = vld [vmem:[%s1060_s5 + $0x8] sm:$0xff] }
  0x20   :  { %213 = vmatpush.bf16.msra.mxu0 %v531_v18  ;;  %v726_v2 = vld [vmem:[%s1060_s5] sm:$0xff] }
  0x21   :  { %241 = vmatpush.bf16.msra.mxu2 %v535_v21 }
  0x22   :  { %467 = vmatpush.bf16.msrb.mxu3 %v732_v56 }
  0x23   :  { %338 = vmatpush.bf16.msrb.mxu1 %v724_v17  ;;  %214 = vmatmul.bf16.vlgmr.msra.gmra.mxu0 %v523_v22 }
  0x24   :  { %242 = vmatmul.bf16.vlgmr.msra.gmra.mxu2 %v523_v22 }
  0x26   :  { %468 = vmatpush.bf16.msrb.mxu3 %v731_v57 }
  0x27   :  { %339 = vmatpush.bf16.msrb.mxu1 %v723_v23 }
  0x2a   :  { %469 = vmatpush.bf16.msrb.mxu3 %v730_v58 }
  0x2b   :  { %340 = vmatpush.bf16.msrb.mxu1 %v722_v24 }
  0x2e   :  { %470 = vmatpush.bf16.msrb.mxu3 %v729_v59 }
  0x2f   :  { %341 = vmatpush.bf16.msrb.mxu1 %v721_v25 }
  0x32   :  { %471 = vmatpush.bf16.msrb.mxu3 %v728_v62 }
  0x33   :  { %342 = vmatpush.bf16.msrb.mxu1 %v720_v26 }
  0x36   :  { %472 = vmatpush.bf16.msrb.mxu3 %v727_v1 }
  0x37   :  { %343 = vmatpush.bf16.msrb.mxu1 %v719_v27 }
  0x3a   :  { %473 = vmatpush.bf16.msrb.mxu3 %v726_v2 }
  0x3b   :  { %344 = vmatpush.bf16.msrb.mxu1 %v718_v28 }
  0x9b   :  { %v229_v31 = vpop.f32.mrf.mxu1 }
  0xa0   :  { %v215_v29 = vpop.f32.mrf.mxu0  ;;  %v257_v34 = vpop.f32.mrf.mxu3 }
  0xa1   :  { %v216_v37 = vadd.f32 %v215_v29, %v57_v32 }
  0xa3   :  { %v230_v40 = vadd.f32 %v229_v31, %v216_v37  ;;  %v231_v42 = vpop.f32.mrf.mxu1 }
  0xa5   :  { %v262_v47 = vmax.f32 %v230_v40, 0.0 }
  0xa7   :  { %v243_v35 = vpop.f32.mrf.mxu2 }
  0xa8   :  { %v217_v36 = vpop.f32.mrf.mxu0  ;;  %v244_v38 = vadd.f32 %v243_v35, %v58_v33  ;;  %v259_v46 = vpop.f32.mrf.mxu3 }
  0xa9   :  { %v218_v39 = vadd.f32 %v217_v36, %v57_v32 }
  0xaa   :  { %v258_v41 = vadd.f32 %v257_v34, %v244_v38 }
  0xab   :  { %v232_v44 = vadd.f32 %v231_v42, %v218_v39  ;;  %v738_v39 = vld [vmem:[%s1061_s6] ss:$0 sm:$0xff]  ;;  %s781_s6 = smov [#allocation2]  }
  0xac   :  { %v263_v48 = vmax.f32 %v258_v41, 0.0  ;;  %s506_s22 = sshll.u32 %s781_s6, 4  ;;  %s507_s22 = int_to_ptr.vmem [resolvable:$true] %s506_s22 }
  0xad   :  { %v264_v50 = vmax.f32 %v232_v44, 0.0 }
  0xae   :  { %v1012_v52 = vmax.f32 %v262_v47, %v263_v48 }
  0xaf   :  { %v245_v43 = vpop.f32.mrf.mxu2 }
  0xb0   :  { %v246_v45 = vadd.f32 %v245_v43, %v58_v33 }
  0xb2   :  { %v260_v49 = vadd.f32 %v259_v46, %v246_v45 }
  0xb4   :  { %v265_v51 = vmax.f32 %v260_v49, 0.0 }
  0xb6   :  { %v1014_v53 = vmax.f32 %v264_v50, %v265_v51 }
  0xb8   :  { %v268_v54 = vpack.c.bf16 %v1014_v53, %v1012_v52 }
  0xba   :  { %345 = vmatmul.bf16.vlgmr.msrb.gmra.mxu1 %v268_v54 }
 0x137   :  { %v346_v61 = vpop.f32.mrf.mxu1 }
 0x138   :  { %v347_v63 = vadd.f32 %v737_v60, %v346_v61 }
 0x13a   :  { %v658_v0 = vmul.f32 -1.442695, %v347_v63  ;;  %v389_v20 = vmax.f32 %v347_v63, 0.0 }
 0x13c   :  { %739 = vpow2.f32 %v658_v0  ;;  %v391_v28 = vsub.f32 %v389_v20, %v1012_v52 }
 0x13f   :  { %v348_v3 = vpop.f32.mrf.mxu1 }
 0x140   :  { %v349_v4 = vadd.f32 %v737_v60, %v348_v3 }
 0x142   :  { %v740_v5 = vpop.eup %739  ;;  %v659_v6 = vmul.f32 -1.442695, %v349_v4  ;;  %v390_v24 = vmax.f32 %v349_v4, 0.0 }
 0x143   :  { %v357_v7 = vadd.f32 1.0, %v740_v5 }
 0x144   :  { %741 = vpow2.f32 %v659_v6  ;;  %v392_v33 = vsub.f32 %v390_v24, %v1014_v53 }
 0x145   :  { %743 = vrcp.f32 %v357_v7  ;;  %v370_v16 = vand.u32 2147483648, %v357_v7  ;;  %vm364_vm3 = vweird.f32 %v357_v7  ;;  %v368_v17 = vand.u32 2147483647, %v357_v7 }
 0x147   :  { %v371_v22 = vor.u32 1.1754944e-38, %v370_v16  ;;  %vm369_vm5 = vcmp.eq.f32.partialorder %v368_v17, 8.507059e+37 }
 0x14a   :  { %v742_v8 = vpop.eup %741 }
 0x14b   :  { %v744_v9 = vpop.eup %743  ;;  %v358_v10 = vadd.f32 1.0, %v742_v8 }
 0x14c   :  { %v360_v11 = vmul.f32 %v744_v9, %v357_v7  ;;  %vm365_vm2 = vweird.f32 %v744_v9 }
 0x14d   :  { %745 = vrcp.f32 %v358_v10  ;;  %vm366_vm4 = vmor %vm364_vm3, %vm365_vm2  ;;  %v385_v23 = vand.u32 2147483648, %v358_v10  ;;  %v383_v26 = vand.u32 2147483647, %v358_v10  ;;  %vm379_vm7 = vweird.f32 %v358_v10 }
 0x14e   :  { %v361_v12 = vsub.f32 1.0, %v360_v11 }
 0x14f   :  { %v386_v30 = vor.u32 1.1754944e-38, %v385_v23  ;;  %vm384_vm9 = vcmp.eq.f32.partialorder %v383_v26, 8.507059e+37 }
 0x150   :  { %v362_v13 = vmul.f32 %v744_v9, %v361_v12 }
 0x152   :  { %v363_v14 = vadd.f32 %v744_v9, %v362_v13 }
 0x153   :  { %v746_v15 = vpop.eup %745 }
 0x154   :  { %v375_v18 = vmul.f32 %v746_v15, %v358_v10  ;;  %v367_v19 = vsel %vm366_vm4, %v744_v9, %v363_v14  ;;  %vm380_vm6 = vweird.f32 %v746_v15 }
 0x155   :  { %v372_v27 = vsel %vm369_vm5, %v371_v22, %v367_v19  ;;  %vm381_vm8 = vmor %vm379_vm7, %vm380_vm6 }
 0x156   :  { %v376_v21 = vsub.f32 1.0, %v375_v18  ;;  %v393_v31 = vmul.f32 %v391_v28, %v372_v27 }
 0x158   :  { %v377_v25 = vmul.f32 %v746_v15, %v376_v21  ;;  %v395_v36 = vadd.f32 %v393_v31, %v1012_v52 }
 0x15a   :  { %v378_v29 = vadd.f32 %v746_v15, %v377_v25 }
 0x15c   :  { %v382_v32 = vsel %vm381_vm8, %v746_v15, %v378_v29 }
 0x15d   :  { %v387_v34 = vsel %vm384_vm9, %v386_v30, %v382_v32 }
 0x15e   :  { %v394_v35 = vmul.f32 %v392_v33, %v387_v34 }
 0x160   :  { %v396_v37 = vadd.f32 %v394_v35, %v1014_v53 }
 0x162   :  { %v397_v38 = vpack.c.bf16 %v396_v37, %v395_v36 }
 0x164   :  { %474 = vmatmul.bf16.vlgmr.msrb.gmra.mxu3 %v397_v38 }
 0x1e7   :  { %v475_v40 = vpop.f32.mrf.mxu3 }
 0x1e8   :  { %v476_v41 = vadd.f32 %v738_v39, %v475_v40 }
 0x1ea   :  { %480 = vmax.xlane.f32.xlu0 %v476_v41 }
 0x1ef   :  { %v477_v42 = vpop.f32.mrf.mxu3 }
 0x1f0   :  { %v478_v43 = vadd.f32 %v738_v39, %v477_v42 }
 0x1f2   :  { %482 = vmax.xlane.f32.xlu0 %v478_v43 }
 0x25d   :  { %v481_v44 = vpop.xlane.xlu0 %480 }
 0x25e   :  { %v484_v45 = vsub.f32 %v476_v41, %v481_v44 }
 0x260   :  { %v486_v46 = vmul.f32 1.442695, %v484_v45 }
 0x262   :  { %747 = vpow2.f32 %v486_v46 }
 0x265   :  { %v483_v47 = vpop.xlane.xlu0 %482 }
 0x266   :  { %v485_v48 = vsub.f32 %v478_v43, %v483_v47 }
 0x268   :  { %v748_v49 = vpop.eup %747  ;;  %v488_v50 = vmul.f32 1.442695, %v485_v48 }
 0x269   :  { %490 = vadd.xlane.f32.xlu1 %v748_v49 }
 0x26a   :  { %749 = vpow2.f32 %v488_v50 }
 0x270   :  { %v750_v51 = vpop.eup %749 }
 0x271   :  { %492 = vadd.xlane.f32.xlu1 %v750_v51 }
 0x2dc   :  { %v491_v52 = vpop.xlane.xlu1 %490 }
 0x2dd   :  { %751 = vlog2.f32 %v491_v52 }
 0x2e3   :  { %v752_v53 = vpop.eup %751 }
 0x2e4   :  { %v495_v54 = vmul.f32 0.6931472, %v752_v53  ;;  %v493_v55 = vpop.xlane.xlu1 %492 }
 0x2e5   :  { %753 = vlog2.f32 %v493_v55 }
 0x2e6   :  { %v498_v56 = vsub.f32 %v484_v45, %v495_v54 }
 0x2e8   :  { %500 = vst [vmem:[#allocation2] sm:$0xff] %v498_v56 }
 0x2eb   :  { %v754_v57 = vpop.eup %753 }
 0x2ec   :  { %v497_v58 = vmul.f32 0.6931472, %v754_v57 }
 0x2ee   :  { %v499_v59 = vsub.f32 %v485_v48, %v497_v58 }
 0x2f0   :  { %501 = vst [vmem:[#allocation2 + $0x8] sm:$0xff] %v499_v59 }
 0x2f1   :  { %514 = dma.vmem_to_hbm [thread:$0]  %s507_s22, 256, %s509_s25, [#allocation3], %s782_s26, %s782_s26, %s783_s27  }
 0x2f2   :  { %779 = dma.done.wait [#allocation3], 256  }
 0x2f3   :  { %780 = vsyncadd [#allocation3], 4294967040 }
 0x2f4   :  { %519 = vsyncpa [#allocation3], 1 }

</bundles_post_ra>
